<compile_context>
chip_gen: v5e
topology: v5e:2x2
jax: 0.10.0
libtpu: 0.0.40
codegen_flags: <defaults>
</compile_context>

<pallas_src>
import functools

import jax
import jax.numpy as jnp
import numpy as np
from jax import lax
from jax.experimental import pallas as pl
from jax.experimental.pallas import tpu as pltpu


def _residual_stack_kernel(
    bidx_ref,         # SMEM (nb,) int32: per-block index into the static dilation table
    x_hbm,            # ANY  (G, Rg, C) f32: per-group flattened, causally pre-padded input
    wk_ref,           # VMEM (1, 2C, 2C)  bf16: fused [[wg_k0|wt_k0],[wg_k1|wt_k1]]
    bgt_ref,          # VMEM (1, 1, 2C)   f32 : [bg | bt]
    wsr_ref,          # VMEM (1, C, Cs+C) bf16: [ws | wr]
    bsr_ref,          # VMEM (1, 1, Cs+C) f32 : [bs | br]
    out_ref,          # VMEM (1, 1, Rg, C) f32: residual output (block i, group g)
    state_ref,        # VMEM (DPAD+Rg, C) f32 : carried signal (+ zero guard rows)
    dma_sem,          # DMA semaphore for the one-shot x load
    *, C, Cs, Bg, SEG, DPAD, Rg, dil_table):
    g = pl.program_id(0)   # batch group (parallel)
    i = pl.program_id(1)   # residual block (serial carry)

    @pl.when(i == 0)
    def _init():
        # Rows [0, DPAD) are an always-zero guard so the shifted view below
        # never touches data from outside the current group.  The per-batch
        # causal pad rows arrive pre-zeroed inside the HBM slab, which is
        # DMA'd straight into the state (no VMEM input buffer for x at all).
        state_ref[pl.ds(0, DPAD), :] = jnp.zeros((DPAD, C), jnp.float32)
        cp = pltpu.make_async_copy(
            x_hbm.at[g], state_ref.at[pl.ds(DPAD, Rg)], dma_sem.at[0])
        cp.start()
        cp.wait()

    full = state_ref[...]            # one aligned (DPAD+Rg, C) load per step
    x_cur = full[DPAD:, :]           # x[t]            (Rg, C) f32

    # x[t-d]: static-shift roll on the XLU, selected over the (few) unique
    # compile-time dilations.  Guard/pad rows make the wrapped region unused.
    def _shift_branch(d):
        def _br():
            return pltpu.roll(full, shift=d, axis=0)[DPAD:, :]
        return _br

    x_shift = lax.switch(bidx_ref[i], [_shift_branch(d) for d in dil_table])

    # Fused causal conv (kernel_size=2, dilation d): one K=2C matmul.
    #   pre = [pre_sigmoid | pre_tanh] = [x(t-d) | x(t)] @ [[Wk0],[Wk1]] + b
    xx = jnp.concatenate([x_shift, x_cur], axis=-1).astype(jnp.bfloat16)   # (Rg, 2C)
    pre = (jnp.dot(xx, wk_ref[0], preferred_element_type=jnp.float32)
           + bgt_ref[0])                                                   # (Rg, 2C) f32

    # Gating kept in f32 (safe on v5e; matches the reference rounding path).
    u = jax.nn.sigmoid(pre[:, :C]) * jnp.tanh(pre[:, C:])

    # Fused 1x1 convs:  sr = [skip | residual]
    sr = (jnp.dot(u.astype(jnp.bfloat16), wsr_ref[0],
                  preferred_element_type=jnp.float32)
          + bsr_ref[0])                                                    # (Rg, Cs+C) f32
    s = sr[:, :Cs]                                                         # skip conv
    r = sr[:, Cs:] + x_cur                                                 # residual conv + x

    # ResidualStack swap: stack the residual output, carry the skip output.
    out_ref[0, 0] = r.astype(out_ref.dtype)

    state_ref[pl.ds(DPAD, Rg), :] = s
    # Re-zero the per-batch causal pad rows (a few tiny static stores replace
    # the old (R,1) mask input and its (R,C) multiply).
    for b in range(Bg):
        state_ref[pl.ds(DPAD + b * SEG, DPAD), :] = jnp.zeros((DPAD, C), jnp.float32)


def residual_stack_forward(x, params, dilations, num_groups=None):
    """x: (B, C, T) float32 (PyTorch NCL).  Returns (num_blocks, B, C, T)."""
    B, C, T = x.shape
    nb = len(dilations)
    Cs = params["ws"].shape[-1]
    assert Cs == C, "ResidualStack.forward only chains when skip == residual channels"

    DMAX = int(max(dilations))
    DPAD = max(8, ((DMAX + 7) // 8) * 8)       # sublane-aligned causal pad per batch
    assert DMAX <= DPAD, "every dilation must fit inside the causal pad region"
    TP = ((T + 7) // 8) * 8                    # tail-pad time so segments stay 8-aligned
    SEG = DPAD + TP

    if num_groups is None:                     # batch-group parallel axis (2 TCs on v7x)
        num_groups = 2 if (B >= 2 and B % 2 == 0) else 1
    G = num_groups
    assert B % G == 0
    Bg = B // G
    Rg = Bg * SEG                              # rows per group (batch folded into sublanes)

    # Channels-last, per-batch causal front pad (+ tail pad), grouped slabs.
    x_tc = jnp.transpose(x, (0, 2, 1))                              # (B, T, C)
    x_pad = jnp.pad(x_tc, ((0, 0), (DPAD, TP - T), (0, 0)))         # (B, SEG, C)
    x_grp = x_pad.reshape(G, Rg, C)                                 # (G, Rg, C)

    # Fused weights: gate|tanh on the output dim, k0|k1 stacked on the K dim,
    # skip|residual on the output dim.  bf16 MXU inputs, f32 accumulation.
    bf = jnp.bfloat16
    wk0 = jnp.concatenate([params["wg"][:, 0], params["wt"][:, 0]], axis=-1)   # (nb, C, 2C)
    wk1 = jnp.concatenate([params["wg"][:, 1], params["wt"][:, 1]], axis=-1)   # (nb, C, 2C)
    wk = jnp.concatenate([wk0, wk1], axis=1).astype(bf)                        # (nb, 2C, 2C)
    bgt = jnp.concatenate([params["bg"], params["bt"]], axis=-1)               # (nb, 1, 2C)
    wsr = jnp.concatenate([params["ws"], params["wr"]], axis=-1).astype(bf)    # (nb, C, Cs+C)
    bsr = jnp.concatenate([params["bs"], params["br"]], axis=-1)               # (nb, 1, Cs+C)

    # Static dilation table + per-block branch index (tiny SMEM prefetch).
    dil_table = tuple(sorted({int(d) for d in dilations}))
    bidx = jnp.asarray([dil_table.index(int(d)) for d in dilations], jnp.int32)

    kernel = functools.partial(_residual_stack_kernel, C=C, Cs=Cs, Bg=Bg,
                               SEG=SEG, DPAD=DPAD, Rg=Rg, dil_table=dil_table)

    grid_spec = pltpu.PrefetchScalarGridSpec(
        num_scalar_prefetch=1,
        grid=(G, nb),                           # parallel batch groups x serial blocks
        in_specs=[
            pl.BlockSpec(memory_space=pl.ANY),                             # x (HBM, DMA'd once/group)
            pl.BlockSpec((1, 2 * C, 2 * C), lambda g, i, bref: (i, 0, 0)),  # wk
            pl.BlockSpec((1, 1, 2 * C), lambda g, i, bref: (i, 0, 0)),      # bgt
            pl.BlockSpec((1, C, Cs + C), lambda g, i, bref: (i, 0, 0)),     # wsr
            pl.BlockSpec((1, 1, Cs + C), lambda g, i, bref: (i, 0, 0)),     # bsr
        ],
        out_specs=pl.BlockSpec((1, 1, Rg, C), lambda g, i, bref: (i, g, 0, 0)),
        scratch_shapes=[pltpu.VMEM((DPAD + Rg, C), jnp.float32),
                        pltpu.SemaphoreType.DMA((1,))],
    )

    # Rough working-set estimate; only raise the scoped-VMEM limit if needed.
    def _lane_bytes(c, item):
        return ((c + 127) // 128) * 128 * item
    est = ((DPAD + Rg) * _lane_bytes(C, 4)              # state scratch
           + 2 * Rg * _lane_bytes(C, 4)                 # double-buffered out block
           + 2 * (2 * C * _lane_bytes(2 * C, 2) + _lane_bytes(2 * C, 4)
                  + C * _lane_bytes(Cs + C, 2) + _lane_bytes(Cs + C, 4))
           + (4 << 20))                                 # compiler headroom
    cp_kwargs = dict(dimension_semantics=("parallel", "arbitrary"))
    if est > (24 << 20):
        # Larger T would eventually need an inner time tiling with a DPAD halo
        # to stay under v7x's 64 MiB; cap conservatively here.
        cp_kwargs["vmem_limit_bytes"] = min(int(est * 1.25), 64 << 20)

    out = pl.pallas_call(
        kernel,
        out_shape=jax.ShapeDtypeStruct((nb, G, Rg, C), jnp.float32),
        grid_spec=grid_spec,
        compiler_params=pltpu.CompilerParams(**cp_kwargs),
    )(bidx, x_grp, wk, bgt, wsr, bsr)

    # (nb, G, Rg, C) -> (nb, B, SEG, C) -> drop pad rows -> (nb, B, C, T)
    out = out.reshape(nb, B, SEG, C)[:, :, DPAD:DPAD + T, :]
    return jnp.transpose(out, (0, 1, 3, 2))


def residual_stack_reference(x, params, dilations):
    """Pure-JAX reference with identical semantics and matching bf16 matmul rounding."""
    B, C, T = x.shape
    hp = lax.Precision.HIGHEST
    bf = jnp.bfloat16
    out = jnp.transpose(x, (0, 2, 1))                # (B, T, C)
    stacked = []
    for n, d in enumerate(dilations):
        x_cur = out
        x_shift = jnp.pad(out, ((0, 0), (d, 0), (0, 0)))[:, :T, :]
        wg, bg = params["wg"][n].astype(bf), params["bg"][n, 0]
        wt, bt = params["wt"][n].astype(bf), params["bt"][n, 0]
        ws, bs = params["ws"][n].astype(bf), params["bs"][n, 0]
        wr, br = params["wr"][n].astype(bf), params["br"][n, 0]
        xs_b, xc_b = x_shift.astype(bf), x_cur.astype(bf)
        pre_g = (jnp.einsum("btc,cd->btd", xs_b, wg[0], precision=hp,
                            preferred_element_type=jnp.float32)
                 + jnp.einsum("btc,cd->btd", xc_b, wg[1], precision=hp,
                              preferred_element_type=jnp.float32) + bg)
        pre_t = (jnp.einsum("btc,cd->btd", xs_b, wt[0], precision=hp,
                            preferred_element_type=jnp.float32)
                 + jnp.einsum("btc,cd->btd", xc_b, wt[1], precision=hp,
                              preferred_element_type=jnp.float32) + bt)
        u = jax.nn.sigmoid(pre_g) * jnp.tanh(pre_t)
        ub = u.astype(bf)
        s = jnp.einsum("btc,cd->btd", ub, ws, precision=hp,
                       preferred_element_type=jnp.float32) + bs
        r = (jnp.einsum("btc,cd->btd", ub, wr, precision=hp,
                        preferred_element_type=jnp.float32) + br + x_cur)
        stacked.append(r)
        out = s                                      # swap: carry skip forward
    y = jnp.stack(stacked)                           # (nb, B, T, C)
    return jnp.transpose(y, (0, 1, 3, 2))


if __name__ == "__main__":
    # Small shapes consistent with the module (num_skip == num_residual, which
    # the original forward implicitly requires to chain at all).
    B, C, Cs, T = 2, 32, 32, 24
    layer_size, stack_size = 3, 2
    dilations = [2 ** l for _ in range(stack_size) for l in range(layer_size)]
    nb = len(dilations)

    key = jax.random.PRNGKey(0)
    keys = jax.random.split(key, 11)
    scale = 0.3
    params = {
        "wg": jax.random.normal(keys[0], (nb, 2, C, C), jnp.float32) * scale,
        "bg": jax.random.normal(keys[1], (nb, 1, C), jnp.float32) * scale,
        "wt": jax.random.normal(keys[2], (nb, 2, C, C), jnp.float32) * scale,
        "bt": jax.random.normal(keys[3], (nb, 1, C), jnp.float32) * scale,
        "ws": jax.random.normal(keys[4], (nb, C, Cs), jnp.float32) * scale,
        "bs": jax.random.normal(keys[5], (nb, 1, Cs), jnp.float32) * scale,
        "wr": jax.random.normal(keys[6], (nb, C, C), jnp.float32) * scale,
        "br": jax.random.normal(keys[7], (nb, 1, C), jnp.float32) * scale,
    }
    x = jax.random.normal(keys[10], (B, C, T), jnp.float32)

    y = jax.block_until_ready(residual_stack_forward(x, params, dilations))
    y_ref = jax.block_until_ready(residual_stack_reference(x, params, dilations))

    assert y.shape == (nb, B, C, T), y.shape
    # bf16 MXU inputs -> looser tolerance than pure f32.
    np.testing.assert_allclose(np.asarray(y), np.asarray(y_ref),
                               rtol=1e-2, atol=1e-2)
    print("KERNEL_OK")
</pallas_src>

<mosaic_0001>
module attributes {stable_mosaic.version = 11 : i64} {
  func.func @_residual_stack_kernel(%arg0: i32, %arg1: i32, %arg2: memref<6xi32, #tpu.memory_space<smem>>, %arg3: memref<2x32x32xf32, #tpu.memory_space<any>>, %arg4: memref<1x64x64xbf16, #tpu.memory_space<vmem>>, %arg5: memref<1x1x64xf32, #tpu.memory_space<vmem>>, %arg6: memref<1x32x64xbf16, #tpu.memory_space<vmem>>, %arg7: memref<1x1x64xf32, #tpu.memory_space<vmem>>, %arg8: memref<1x1x32x32xf32, #tpu.memory_space<vmem>>, %arg9: memref<40x32xf32, #tpu.memory_space<vmem>>, %arg10: memref<1x!tpu.dma_semaphore, #tpu.memory_space<semaphore_mem>>) attributes {dimension_semantics = [#tpu.dimension_semantics<parallel>, #tpu.dimension_semantics<arbitrary>], iteration_bounds = array<i64: 2, 6>, scalar_prefetch = 1 : i64, scratch_operands = 2 : i64, tpu.core_type = #tpu.core_type<tc>, window_params = [{}, {transform_indices = @transform_1, window_bounds = array<i64: 1, 64, 64>}, {transform_indices = @transform_2, window_bounds = array<i64: 1, 1, 64>}, {transform_indices = @transform_3, window_bounds = array<i64: 1, 32, 64>}, {transform_indices = @transform_4, window_bounds = array<i64: 1, 1, 64>}, {transform_indices = @transform_5, window_bounds = array<i64: 1, 1, 32, 32>}]} {
    %c0_i32 = arith.constant 0 : i32
    %0 = arith.cmpi eq, %arg1, %c0_i32 : i32
    %1 = arith.extui %0 : i1 to i32
    %c0_i32_0 = arith.constant 0 : i32
    %2 = arith.cmpi ne, %1, %c0_i32_0 : i32
    scf.if %2 {
      %cst_26 = arith.constant 0.000000e+00 : f32
      %46 = vector.broadcast %cst_26 : f32 to vector<8x32xf32>
      %c0_27 = arith.constant 0 : index
      %c0_28 = arith.constant 0 : index
      %47 = vector.load %arg9[%c0_27, %c0_28] : memref<40x32xf32, #tpu.memory_space<vmem>>, vector<8x32xf32>
      tpu.vector_store %arg9[%c0_27, %c0_28], %46 {strides = array<i32>} : memref<40x32xf32, #tpu.memory_space<vmem>>, vector<8x32xf32>,
      %c0_i32_29 = arith.constant 0 : i32
      %c0_i32_30 = arith.constant 0 : i32
      %c0_i32_31 = arith.constant 0 : i32
      %48 = tpu.memref_slice %arg3[%arg0, %c0_i32_30, %c0_i32_31] : memref<2x32x32xf32, #tpu.memory_space<any>> -> memref<1x32x32xf32, #tpu.memory_space<any>>
      %49 = tpu.memref_squeeze %48 : memref<1x32x32xf32, #tpu.memory_space<any>> -> memref<32x32xf32, #tpu.memory_space<any>>
      %c8_i32 = arith.constant 8 : i32
      %c0_i32_32 = arith.constant 0 : i32
      %50 = tpu.memref_slice %arg9[%c8_i32, %c0_i32_32] : memref<40x32xf32, #tpu.memory_space<vmem>> -> memref<32x32xf32, #tpu.memory_space<vmem>>
      %51 = tpu.memref_slice %arg10[%c0_i32_29] : memref<1x!tpu.dma_semaphore, #tpu.memory_space<semaphore_mem>> -> memref<1x!tpu.dma_semaphore, #tpu.memory_space<semaphore_mem>>
      %52 = tpu.memref_squeeze %51 : memref<1x!tpu.dma_semaphore, #tpu.memory_space<semaphore_mem>> -> memref<!tpu.dma_semaphore, #tpu.memory_space<semaphore_mem>>
      tpu.enqueue_dma source(%49 : memref<32x32xf32, #tpu.memory_space<any>>) target(%50 : memref<32x32xf32, #tpu.memory_space<vmem>>) target_semaphore(%52 : memref<!tpu.dma_semaphore, #tpu.memory_space<semaphore_mem>>)
      %c0_i32_33 = arith.constant 0 : i32
      %c0_i32_34 = arith.constant 0 : i32
      %c0_i32_35 = arith.constant 0 : i32
      %53 = tpu.memref_slice %arg3[%arg0, %c0_i32_34, %c0_i32_35] : memref<2x32x32xf32, #tpu.memory_space<any>> -> memref<1x32x32xf32, #tpu.memory_space<any>>
      %54 = tpu.memref_squeeze %53 : memref<1x32x32xf32, #tpu.memory_space<any>> -> memref<32x32xf32, #tpu.memory_space<any>>
      %c8_i32_36 = arith.constant 8 : i32
      %c0_i32_37 = arith.constant 0 : i32
      %55 = tpu.memref_slice %arg9[%c8_i32_36, %c0_i32_37] : memref<40x32xf32, #tpu.memory_space<vmem>> -> memref<32x32xf32, #tpu.memory_space<vmem>>
      %56 = tpu.memref_slice %arg10[%c0_i32_33] : memref<1x!tpu.dma_semaphore, #tpu.memory_space<semaphore_mem>> -> memref<1x!tpu.dma_semaphore, #tpu.memory_space<semaphore_mem>>
      %57 = tpu.memref_squeeze %56 : memref<1x!tpu.dma_semaphore, #tpu.memory_space<semaphore_mem>> -> memref<!tpu.dma_semaphore, #tpu.memory_space<semaphore_mem>>
      tpu.wait_dma2 semaphore(%57 : memref<!tpu.dma_semaphore, #tpu.memory_space<semaphore_mem>>) src(%54 : memref<32x32xf32, #tpu.memory_space<any>>) dst(%55 : memref<32x32xf32, #tpu.memory_space<vmem>>)
    } else {
    }
    %c0 = arith.constant 0 : index
    %c0_1 = arith.constant 0 : index
    %3 = vector.load %arg9[%c0, %c0_1] : memref<40x32xf32, #tpu.memory_space<vmem>>, vector<40x32xf32>
    %4 = vector.extract_strided_slice %3 {offsets = [8, 0], sizes = [32, 32], strides = [1, 1]} : vector<40x32xf32> to vector<32x32xf32>
    %5 = arith.index_cast %arg1 : i32 to index
    %6 = memref.load %arg2[%5] : memref<6xi32, #tpu.memory_space<smem>>
    %c0_i32_2 = arith.constant 0 : i32
    %c2_i32 = arith.constant 2 : i32
    %7 = arith.maxsi %6, %c0_i32_2 : i32
    %8 = arith.minsi %7, %c2_i32 : i32
    %c0_i32_3 = arith.constant 0 : i32
    %9 = arith.cmpi ne, %8, %c0_i32_3 : i32
    %10 = scf.if %9 -> (vector<32x32xf32>) {
      %c1_i32 = arith.constant 1 : i32
      %46 = arith.subi %8, %c1_i32 : i32
      %c0_i32_26 = arith.constant 0 : i32
      %47 = arith.cmpi ne, %46, %c0_i32_26 : i32
      %48 = scf.if %47 -> (vector<32x32xf32>) {
        %c4_i32 = arith.constant 4 : i32
        %49 = tpu.dynamic_rotate %3 by %c4_i32 dim 0 : vector<40x32xf32>, i32 -> vector<40x32xf32>
        %50 = vector.extract_strided_slice %49 {offsets = [8, 0], sizes = [32, 32], strides = [1, 1]} : vector<40x32xf32> to vector<32x32xf32>
        scf.yield %50 : vector<32x32xf32>
      } else {
        %c2_i32_27 = arith.constant 2 : i32
        %49 = tpu.dynamic_rotate %3 by %c2_i32_27 dim 0 : vector<40x32xf32>, i32 -> vector<40x32xf32>
        %50 = vector.extract_strided_slice %49 {offsets = [8, 0], sizes = [32, 32], strides = [1, 1]} : vector<40x32xf32> to vector<32x32xf32>
        scf.yield %50 : vector<32x32xf32>
      }
      scf.yield %48 : vector<32x32xf32>
    } else {
      %c1_i32 = arith.constant 1 : i32
      %46 = tpu.dynamic_rotate %3 by %c1_i32 dim 0 : vector<40x32xf32>, i32 -> vector<40x32xf32>
      %47 = vector.extract_strided_slice %46 {offsets = [8, 0], sizes = [32, 32], strides = [1, 1]} : vector<40x32xf32> to vector<32x32xf32>
      scf.yield %47 : vector<32x32xf32>
    }
    %11 = tpu.concatenate %10, %4 in 1 : vector<32x32xf32>, vector<32x32xf32> -> vector<32x64xf32>
    %12 = arith.truncf %11 : vector<32x64xf32> to vector<32x64xbf16>
    %c0_4 = arith.constant 0 : index
    %c0_5 = arith.constant 0 : index
    %c0_6 = arith.constant 0 : index
    %13 = vector.load %arg4[%c0_4, %c0_5, %c0_6] : memref<1x64x64xbf16, #tpu.memory_space<vmem>>, vector<1x64x64xbf16>
    %14 = vector.shape_cast %13 : vector<1x64x64xbf16> to vector<64x64xbf16>
    %cst = arith.constant dense<0.000000e+00> : vector<32x64xf32>
    %15 = tpu.matmul %12, %14, %cst {dimension_numbers = #tpu.dot_dimension_numbers<[1], [0], [0], [1], [0, 0, 1, 1], [], []>} : vector<32x64xbf16>, vector<64x64xbf16>, vector<32x64xf32> -> vector<32x64xf32>
    %c0_7 = arith.constant 0 : index
    %c0_8 = arith.constant 0 : index
    %c0_9 = arith.constant 0 : index
    %16 = vector.load %arg5[%c0_7, %c0_8, %c0_9] : memref<1x1x64xf32, #tpu.memory_space<vmem>>, vector<1x1x64xf32>
    %17 = vector.shape_cast %16 : vector<1x1x64xf32> to vector<1x64xf32>
    %18 = vector.broadcast %17 : vector<1x64xf32> to vector<32x64xf32>
    %19 = arith.addf %15, %18 : vector<32x64xf32>
    %20 = vector.extract_strided_slice %19 {offsets = [0, 0], sizes = [32, 32], strides = [1, 1]} : vector<32x64xf32> to vector<32x32xf32>
    %21 = arith.negf %20 : vector<32x32xf32>
    %22 = math.exp %21 : vector<32x32xf32>
    %cst_10 = arith.constant 1.000000e+00 : f32
    %23 = vector.broadcast %cst_10 : f32 to vector<32x32xf32>
    %24 = arith.addf %23, %22 : vector<32x32xf32>
    %25 = arith.divf %23, %24 : vector<32x32xf32>
    %26 = vector.extract_strided_slice %19 {offsets = [0, 32], sizes = [32, 32], strides = [1, 1]} : vector<32x64xf32> to vector<32x32xf32>
    %27 = math.tanh %26 : vector<32x32xf32>
    %28 = arith.mulf %25, %27 : vector<32x32xf32>
    %29 = arith.truncf %28 : vector<32x32xf32> to vector<32x32xbf16>
    %c0_11 = arith.constant 0 : index
    %c0_12 = arith.constant 0 : index
    %c0_13 = arith.constant 0 : index
    %30 = vector.load %arg6[%c0_11, %c0_12, %c0_13] : memref<1x32x64xbf16, #tpu.memory_space<vmem>>, vector<1x32x64xbf16>
    %31 = vector.shape_cast %30 : vector<1x32x64xbf16> to vector<32x64xbf16>
    %cst_14 = arith.constant dense<0.000000e+00> : vector<32x64xf32>
    %32 = tpu.matmul %29, %31, %cst_14 {dimension_numbers = #tpu.dot_dimension_numbers<[1], [0], [0], [1], [0, 0, 1, 1], [], []>} : vector<32x32xbf16>, vector<32x64xbf16>, vector<32x64xf32> -> vector<32x64xf32>
    %c0_15 = arith.constant 0 : index
    %c0_16 = arith.constant 0 : index
    %c0_17 = arith.constant 0 : index
    %33 = vector.load %arg7[%c0_15, %c0_16, %c0_17] : memref<1x1x64xf32, #tpu.memory_space<vmem>>, vector<1x1x64xf32>
    %34 = vector.shape_cast %33 : vector<1x1x64xf32> to vector<1x64xf32>
    %35 = vector.broadcast %34 : vector<1x64xf32> to vector<32x64xf32>
    %36 = arith.addf %32, %35 : vector<32x64xf32>
    %37 = vector.extract_strided_slice %36 {offsets = [0, 0], sizes = [32, 32], strides = [1, 1]} : vector<32x64xf32> to vector<32x32xf32>
    %38 = vector.extract_strided_slice %36 {offsets = [0, 32], sizes = [32, 32], strides = [1, 1]} : vector<32x64xf32> to vector<32x32xf32>
    %39 = arith.addf %38, %4 : vector<32x32xf32>
    %c0_18 = arith.constant 0 : index
    %c0_19 = arith.constant 0 : index
    %c0_20 = arith.constant 0 : index
    %c0_21 = arith.constant 0 : index
    %40 = vector.load %arg8[%c0_18, %c0_19, %c0_20, %c0_21] : memref<1x1x32x32xf32, #tpu.memory_space<vmem>>, vector<1x1x32x32xf32>
    %41 = vector.shape_cast %40 : vector<1x1x32x32xf32> to vector<32x32xf32>
    %42 = vector.shape_cast %39 : vector<32x32xf32> to vector<1x1x32x32xf32>
    tpu.vector_store %arg8[%c0_18, %c0_19, %c0_20, %c0_21], %42 {strides = array<i32>} : memref<1x1x32x32xf32, #tpu.memory_space<vmem>>, vector<1x1x32x32xf32>,
    %c8 = arith.constant 8 : index
    %c0_22 = arith.constant 0 : index
    %43 = vector.load %arg9[%c8, %c0_22] : memref<40x32xf32, #tpu.memory_space<vmem>>, vector<32x32xf32>
    tpu.vector_store %arg9[%c8, %c0_22], %37 {strides = array<i32>} : memref<40x32xf32, #tpu.memory_space<vmem>>, vector<32x32xf32>,
    %cst_23 = arith.constant 0.000000e+00 : f32
    %44 = vector.broadcast %cst_23 : f32 to vector<8x32xf32>
    %c8_24 = arith.constant 8 : index
    %c0_25 = arith.constant 0 : index
    %45 = vector.load %arg9[%c8_24, %c0_25] : memref<40x32xf32, #tpu.memory_space<vmem>>, vector<8x32xf32>
    tpu.vector_store %arg9[%c8_24, %c0_25], %44 {strides = array<i32>} : memref<40x32xf32, #tpu.memory_space<vmem>>, vector<8x32xf32>,
    return
  }
  func.func @transform_1(%arg0: i32, %arg1: i32, %arg2: memref<6xi32, #tpu.memory_space<smem>>) -> (i32, i32, i32) {
    %c0_i32 = arith.constant 0 : i32
    %c0_i32_0 = arith.constant 0 : i32
    %c0_i32_1 = arith.constant 0 : i32
    return %arg1, %c0_i32, %c0_i32_0 : i32, i32, i32
  }
  func.func @transform_2(%arg0: i32, %arg1: i32, %arg2: memref<6xi32, #tpu.memory_space<smem>>) -> (i32, i32, i32) {
    %c0_i32 = arith.constant 0 : i32
    %c0_i32_0 = arith.constant 0 : i32
    %c0_i32_1 = arith.constant 0 : i32
    return %arg1, %c0_i32, %c0_i32_0 : i32, i32, i32
  }
  func.func @transform_3(%arg0: i32, %arg1: i32, %arg2: memref<6xi32, #tpu.memory_space<smem>>) -> (i32, i32, i32) {
    %c0_i32 = arith.constant 0 : i32
    %c0_i32_0 = arith.constant 0 : i32
    %c0_i32_1 = arith.constant 0 : i32
    return %arg1, %c0_i32, %c0_i32_0 : i32, i32, i32
  }
  func.func @transform_4(%arg0: i32, %arg1: i32, %arg2: memref<6xi32, #tpu.memory_space<smem>>) -> (i32, i32, i32) {
    %c0_i32 = arith.constant 0 : i32
    %c0_i32_0 = arith.constant 0 : i32
    %c0_i32_1 = arith.constant 0 : i32
    return %arg1, %c0_i32, %c0_i32_0 : i32, i32, i32
  }
  func.func @transform_5(%arg0: i32, %arg1: i32, %arg2: memref<6xi32, #tpu.memory_space<smem>>) -> (i32, i32, i32, i32) {
    %c0_i32 = arith.constant 0 : i32
    %c0_i32_0 = arith.constant 0 : i32
    %c0_i32_1 = arith.constant 0 : i32
    return %arg1, %arg0, %c0_i32, %c0_i32_0 : i32, i32, i32, i32
  }
}

</mosaic_0001>

<bundles_post_ra>
// kernel: tpu_custom_call.1
= control target key start
LH: loop header
LB: loop body
LE: loop exit
PB: predicated region body
PF: predicated region fallthrough
CT: control target
= control target key end

     0   :  { %s1482_s24 = smov [#allocation5]   ;;  %s1907_s0 = inlined_call_operand.hbm [shape: s32[6], index: 0, kind: input, shape index: {}]   ;;  %s1908_s1 = inlined_call_operand.hbm [shape: f32[2,32,32], index: 1, kind: input, shape index: {}]   ;;  %s1909_s2 = inlined_call_operand.hbm [shape: bf16[6,64,64], index: 2, kind: input, shape index: {}]   ;;  %s1910_s3 = inlined_call_operand.hbm [shape: f32[6,1,64], index: 3, kind: input, shape index: {}]   ;;  %s1911_s4 = inlined_call_operand.hbm [shape: bf16[6,32,64], index: 4, kind: input, shape index: {}]   ;;  %s1912_s5 = inlined_call_operand.hbm [shape: f32[6,1,64], index: 5, kind: input, shape index: {}]   ;;  %s1913_s6 = inlined_call_operand.hbm [shape: f32[6,2,32,32], index: 6, kind: output, shape index: {}]  }
   0x1   :  { %1926 = sst [smem:[#allocation36_spill]] %s1909_s2  ;;  %s12_s23 = sshll.u32 %s1907_s0, 4  ;;  %s13_s23 = int_to_ptr.hbm [resolvable:$true] %s12_s23 }
   0x2   :  { %1927 = sst [smem:[#allocation37_spill]] %s1910_s3 }
   0x3   :  { %1928 = sst [smem:[#allocation38_spill]] %s1913_s6 }
   0x4   :  { %15 = dma.hbm_to_smem %s13_s23, 16, %s1482_s24, [#allocation4] }
   0x5   :  { %1418 = dma.done.wait [#allocation4], 16 }
   0x6   :  { %1419 = vsyncadd [#allocation4], 4294967280 }
   0x7   :  { %18 = sfence }
   0x8   :  { %19 = vsyncpa [#allocation7], 0 }
   0x9   :  { %21 = vsyncpa [#allocation7 + $0x1], 0 }
   0xa   :  { %22 = vsyncpa [#allocation10], 0 }
   0xb   :  { %24 = vsyncpa [#allocation10 + $0x1], 0 }
   0xc   :  { %25 = vsyncpa [#allocation13], 0 }
   0xd   :  { %27 = vsyncpa [#allocation13 + $0x1], 0 }
   0xe   :  { %28 = vsyncpa [#allocation8], 0 }
   0xf   :  { %30 = vsyncpa [#allocation8 + $0x1], 0  ;;  %s1530_s25 = smov 0   ;;  %s1532_s26 = smov 0  }
  0x10   :  { %s1534_s27 = smov 0   ;;  %s1536_s0 = smov 0  }
  0x11   :  { %s1538_s28 = smov 0   ;;  %s1540_s29 = smov 0  }
  0x12   :  { %s1542_s30 = smov 0   ;;  %s1544_s7 = smov 0  }
  0x13   :  { %s1546_s8 = smov 0   ;;  %s1548_s9 = smov 0  }
  0x14   :  { %s1550_s10 = smov 0  }
  0x15 LB: > { %1929 = sst [smem:[#allocation25_spill]] %s1440_s25  ;;  %s1584_s11 = sadd.s32 4294967295, %s1480_s10   ;;  %s1480_s10 = sphi %s1550_s10, %s36_s10   ;;  %s1476_s9 = sphi %s1548_s9, %s1963_s9   ;;  %s1472_s8 = sphi %s1546_s8, %s1969_s8   ;;  %s1468_s7 = sphi %s1544_s7, %s1961_s7   ;;  %s1464_s30 = sphi %s1542_s30, %s1968_s30   ;;  %s1460_s29 = sphi %s1540_s29, %s1960_s29   ;;  %s1456_s28 = sphi %s1538_s28, %s1967_s28   ;;  %s1452_s0 = sphi %s1536_s0, %s1966_s0   ;;  %s1448_s27 = sphi %s1534_s27, %s1958_s27   ;;  %s1444_s26 = sphi %s1532_s26, %s1965_s26   ;;  %s1440_s25 = sphi %s1530_s25, %s1964_s25  }
  0x16   : > { %1930 = sst [smem:[#allocation26_spill]] %s1448_s27  ;;  %s887_s12 = sadd.s32 4294967294, %s1480_s10  }
  0x17   : > { %1931 = sst [smem:[#allocation27_spill]] %s1460_s29  ;;  %s45_s13 = sadd.s32 1, %s1472_s8 }
  0x18   : > { %1932 = sst [smem:[#allocation28_spill]] %s1476_s9  ;;  %s48_s14 = sadd.s32 1, %s1476_s9 }
  0x19   : > { %1933 = sst [smem:[#allocation29_spill]] %s1480_s10  ;;  %p46_p0 = scmp.ge.s32.totalorder %s45_s13, 6 }
  0x1a   : > { %s55_s15 = sadd.s32 1, %s1460_s29  ;;  %p62_p1 = scmp.ne.s32.totalorder %s1460_s29, %s1456_s28 }
  0x1b   : > { %p63_p2 = scmp.eq.s32.totalorder %s1480_s10, 0  ;;  %s1971_s13 = smov (%p46_p0, %s45_s13), 0 }
  0x1c   : > { %1934 = sst [smem:[#allocation30_spill]] %s1971_s13  ;;  %s1973_s14 = smov (!%p46_p0, %s48_s14), %s1476_s9 }
  0x1d   : > { %s52_s16 = ssub.s32 %s1472_s8, %s1971_s13  ;;  %p1598_p3 = por %p63_p2, %p62_p1 }
  0x1e   : > { %p50_p4 = scmp.ge.s32.totalorder %s1973_s14, 2  ;;  %p53_p5 = scmp.eq.s32.totalorder %s52_s16, 0 }
  0x1f   : > { %p68_p6 = scmp.ne.s32.totalorder %s1456_s28, %s1452_s0  ;;  %p69_p7 = scmp.eq.s32.totalorder %s1584_s11, 0 }
  0x20   : > { %s1975_s14 = smov (%p50_p4, %s1973_s14), 0  ;;  %s161_s22 = sadd.s32 1, %s1448_s27 }
  0x21   : > { %1936 = sst [smem:[#allocation31_spill]] %s1975_s14  ;;  %p1609_p8 = por %p69_p7, %p68_p6 }
  0x22   : > { %s1607_s18 = scalar_select %p53_p5, %s1460_s29, %s55_s15  }
  0x23   : > { %s157_s20 = ssub.s32 %s1476_s9, %s1975_s14  ;;  %p171_p10 = scmp.ne.s32.totalorder %s1448_s27, %s1444_s26 }
  0x24   : > { %1937 = sst [smem:[#allocation32_spill]] %s1607_s18  ;;  %s158_s21 = sor.u32 %s157_s20, %s52_s16 }
  0x25   : > { %p159_p9 = scmp.eq.s32.totalorder %s158_s21, 0  ;;  %p172_p11 = scmp.eq.s32.totalorder %s1584_s11, 11 }
  0x26   : > { %p177_p12 = scmp.ne.s32.totalorder %s1444_s26, %s1440_s25  ;;  %p178_p0 = scmp.eq.s32.totalorder %s887_s12, 11 }
  0x27   : > { %s1622_s23 = scalar_select %p159_p9, %s1448_s27, %s161_s22  }
  0x28   : > { %p1624_p13 = por %p172_p11, %p171_p10  ;;  %p1060_p1 = scmp.lt.s32.totalorder %s1480_s10, 12 }
  0x29   : > { %1939 = sst [smem:[#allocation33_spill]] %s1622_s23  ;;  %p1629_p2 = por %p178_p0, %p177_p12 }
  0x2a   : > { %s1940_s24 = scalar_select %p1624_p13, 1, 0 }
  0x2b   : > { %s1942_s0 = scalar_select %p1629_p2, 1, 0 }
  0x2c   : > { %1941 = sst [smem:[#allocation34_spill]] %s1940_s24  ;;  %s1634_s15 = sand.u32 1, %s1460_s29  }
  0x2d   : > { %1943 = sst [smem:[#allocation35_spill]] %s1942_s0  ;;  %p1638_p4 = pnand %p1060_p1, %p1598_p3 }
  0x2e   : > { %s220_s20 = sand.u32 1, %s1480_s10   ;;  %s1945_s3 = sld [smem:[#allocation37_spill]] }
  0x2f   : > { %s223_s13 = scalar_lea.vmem [#allocation9], %s1634_s15  ;;  %s1648_s18 = scalar_lea.sflag [#allocation10], %s220_s20 }
  0x30   : > { %s230_s9 = sshll.u32 %s223_s13, 4  ;;  %p896_p3 = scmp.ge.s32.totalorder %s1480_s10, 1  ;;  %s231_s9 = int_to_ptr.vmem [resolvable:$true] %s230_s9 }
  0x31   : > { %p274_p5 = scmp.lt.s32.totalorder %s1480_s10, 13  ;;  %s890_s21 = sshll.u32 %s1634_s15, 5 }
  0x32   : > { %s949_s22 = sshll.u32 %s1472_s8, 5  ;;  %s1947_s2 = sld [smem:[#allocation36_spill]] }
  0x33   : > { %p1655_p6 = pnand %p896_p3, %p274_p5  ;;  %s202_s29 = scalar_lea.vmem [#allocation6], %s890_s21 }
  0x34   : > { %s226_s12 = scalar_lea.hbm %s1945_s3, %s1472_s8  ;;  %s210_s23 = sshll.u32 %s202_s29, 4  ;;  %s211_s23 = int_to_ptr.vmem [resolvable:$true] %s210_s23 }
  0x35   : > { %s228_s14 = sshll.u32 %s226_s12, 4  ;;  %s1484_s27 = smov 4   ;;  %s229_s14 = int_to_ptr.hbm [resolvable:$true] %s228_s14 }
  0x36   : > { %1032 = dma.hbm_to_vmem [thread:$0]  (!%p1638_p4), %s229_s14, 16, %s231_s9, %s1648_s18  }
  0x37   : > { %s199_s9 = scalar_lea.sflag [#allocation7], %s1634_s15  ;;  %s1483_s14 = smov 64  }
  0x38   : > { %s207_s3 = scalar_lea.hbm %s1947_s2, %s949_s22  ;;  %s893_s0 = sshll.u32 %s1634_s15, 4 }
  0x39   : > { %s208_s20 = sshll.u32 %s207_s3, 4  ;;  %s950_s25 = sshll.u32 %s1472_s8, 4  ;;  %s209_s20 = int_to_ptr.hbm [resolvable:$true] %s208_s20 }
  0x3a   : > { %1029 = dma.hbm_to_vmem [thread:$0]  (!%p1638_p4), %s209_s20, 512, %s211_s23, %s199_s9, %s1483_s14, %s1483_s14, %s1484_s27  }
  0x3b   : > { %s246_s3 = scalar_lea.hbm %s1911_s4, %s950_s25  ;;  %s241_s12 = scalar_lea.vmem [#allocation11], %s893_s0 }
  0x3c   : > { %s247_s21 = sshll.u32 %s246_s3, 4  ;;  %s249_s29 = sshll.u32 %s241_s12, 4  ;;  %s248_s21 = int_to_ptr.hbm [resolvable:$true] %s247_s21  ;;  %s250_s29 = int_to_ptr.vmem [resolvable:$true] %s249_s29 }
  0x3d   : > { %1035 = dma.hbm_to_vmem [thread:$0]  (!%p1638_p4), %s248_s21, 256, %s250_s29, %s1648_s18, %s1483_s14, %s1483_s14, %s1484_s27  }
  0x3e   : > { %s265_s6 = scalar_lea.hbm %s1912_s5, %s1472_s8  ;;  %s262_s23 = scalar_lea.vmem [#allocation12], %s1634_s15 }
  0x3f   : > { %s269_s20 = sshll.u32 %s262_s23, 4  ;;  %s267_s9 = sshll.u32 %s265_s6, 4  ;;  %s270_s20 = int_to_ptr.vmem [resolvable:$true] %s269_s20  ;;  %s268_s9 = int_to_ptr.hbm [resolvable:$true] %s267_s9 }
  0x40   : > { %s260_s24 = scalar_lea.sflag [#allocation13], %s1634_s15  ;;  %278 = sbr.rel (%p1655_p6) target bundleno = 739 (0x2e3), region = 36 }
  0x41   : > { %1038 = dma.hbm_to_vmem [thread:$0]  (!%p1638_p4), %s268_s9, 16, %s270_s20, %s260_s24  }
  0x42   : > { %s1686_s25 = sand.u32 (!%p1655_p6), 1, %s1456_s28  }
  0x43   : > { %s897_s27 = sshll.u32 (!%p1655_p6), %s1686_s25, 5  ;;  %s281_s2 = scalar_lea.sflag (!%p1655_p6), [#allocation7], %s1686_s25 }
  0x44   : > { %s1690_s10 = scalar_lea.vmem (!%p1655_p6), [#allocation6], %s897_s27 }
  0x45   : > { %1421 = dma.done.wait (%p1609_p8), %s281_s2, 512  }
  0x46   : > { %1423 = vsyncadd (%p1609_p8), %s281_s2, 4294966784  ;;  %s290_s6 = sand.u32 1, %s1584_s11   ;;  %s293_s24 = scalar_lea.vmem [#allocation9], %s1686_s25 }
  0x47   : > { %s291_s18 = scalar_lea.sflag [#allocation10], %s290_s6 }
  0x48   : > { %1425 = dma.done.wait (%p1609_p8), %s291_s18, 272  }
  0x49   : > { %1427 = vsyncadd (%p1609_p8), %s291_s18, 4294967024  ;;  %s898_s0 = sshll.u32 %s1686_s25, 4  ;;  %s310_s16 = scalar_lea.sflag [#allocation13], %s1686_s25 }
  0x4a   : > { %s1703_s15 = scalar_lea.vmem [#allocation11], %s898_s0  ;;  %s312_s17 = scalar_lea.vmem [#allocation12], %s1686_s25 }
  0x4b   : > { %1429 = dma.done.wait (%p1609_p8), %s310_s16, 16  }
  0x4c   : > { %1431 = vsyncadd (%p1609_p8), %s310_s16, 4294967280  ;;  %s348_s11 = sand.u32 1, %s1444_s26   ;;  %p900_p7 = scmp.ne.s32.totalorder %s1464_s30, 0 }
  0x4d   : > { %s899_s14 = sshll.u32 %s348_s11, 5  ;;  %s901_s22 = sshll.u32 (!%p900_p7), %s1468_s7, 5 }
  0x4e   : > { %s1714_s13 = scalar_lea.vmem [#allocation14], %s899_s14  ;;  %355 = sbr.rel (%p900_p7) target bundleno = 93 (0x5d), region = 56 }
  0x4f   : > { %s359_s19 = scalar_lea.hbm (!%p900_p7), %s1908_s1, %s901_s22  ;;  %s1486_s12 = smov (!%p900_p7), [#allocation2 + $0x8]  }
  0x50   : > { %s370_s29 = sshll.u32 (!%p900_p7), %s1486_s12, 4  ;;  %s368_s23 = sshll.u32 (!%p900_p7), %s359_s19, 4  ;;  %s371_s29 = int_to_ptr.vmem [resolvable:$true] %s370_s29  ;;  %s369_s23 = int_to_ptr.hbm [resolvable:$true] %s368_s23 }
  0x51   : > { %s1322_s20 = sshra.s32 (!%p900_p7), %s369_s23, 4  ;;  %s1326_s6 = scalar_lea.hbm (!%p900_p7), %s1908_s1, 64  ;;  %s1323_s20 = int_to_ptr.hbm [resolvable:$true] %s1322_s20 }
  0x52   : > { %s1324_s9 = scalar_lea.hbm (!%p900_p7), %s1323_s20, 32  ;;  %p1327_p9 = scmp.lt.s32.totalorder (!%p900_p7), %s1323_s20, %s1908_s1 }
  0x53   : > { %vm356_vm0 = vcmask 261120   ;;  %v1485_v0 = vmov 0.0   ;;  %p1325_p8 = scmp.ne.s32.totalorder %s1323_s20, %s1324_s9  ;;  %p1328_p10 = scmp.lt.s32.totalorder %s1326_s6, %s1324_s9 }
  0x54   : > { %357 = vst.msk [vmem:[#allocation2] sm:$0xff] %vm356_vm0, %v1485_v0 }
  0x55   : > { %p1329_p11 = por %p1328_p10, %p1327_p9 }
  0x57   : > { %p1330_p12 = pnand %p1329_p11, %p1325_p8 }
  0x59   : > { %1333 = shalt.err (!%p1330_p12)  }
  0x5a   : > { %373 = dma.hbm_to_vmem [thread:$0]  %s369_s23, 512, %s371_s29, [#allocation3] }
  0x5b   : > { %1432 = dma.done.wait [#allocation3], 512 }
  0x5c   : > { %1433 = vsyncadd [#allocation3], 4294966784 }
  0x5d PF: > { %v1727_v1 = vld [vmem:[#allocation2 + $0x18] sm:$0xff]  ;;  %v1729_v2 = vld [vmem:[#allocation2 + $0x8] sm:$0xff]  ;;  %s1487_s16 = smov 32   ;;  %v956_v3 = vld [vmem:[%s1690_s10 + $0x18] sm:$0xff]  ;;  %s382_s14 = sld [smem:[#allocation5 + %s1464_s30]]  ;;  %v401_v9 = vlaneseq  ;;  %vm470_vm8 = vcmask 261120  }
  0x5e   : > { %462 = vrot.lane.b32.xlu0 %v1727_v1, %s1487_s16  ;;  %458 = vrot.lane.b32.xlu1 %v1729_v2, %s1487_s16  ;;  %v1734_v4 = vld [vmem:[#allocation2 + $0x20] sm:$0xff]  ;;  %v1736_v5 = vld [vmem:[#allocation2 + $0x10] sm:$0xff]  ;;  %v955_v6 = vld [vmem:[%s1690_s10 + $0x10] sm:$0xff]  ;;  %v399_v12 = vrot.slane %v1727_v1, 4  ;;  %v397_v14 = vrot.slane %v1729_v2, 4  ;;  %v418_v18 = vrot.slane %v1727_v1, 6 }
  0x5f   : > { %524 = vmatpush.bf16.msra.mxu0 %v956_v3  ;;  %959 = vmatpush.bf16.msra.mxu2 %v956_v3  ;;  %v954_v7 = vld [vmem:[%s1690_s10 + $0x8] sm:$0xff]  ;;  %v953_v8 = vld [vmem:[%s1690_s10] sm:$0xff]  ;;  %v402_v10 = vshrl.u32 %v401_v9, 7  ;;  %v377_v11 = vld [vmem:[#allocation2] sm:$0xff]  ;;  %v398_v13 = vrot.slane %v1736_v5, 4  ;;  %v400_v16 = vrot.slane %v1734_v4, 4 }
  0x60   : > { %v396_v15 = vrot.slane %v377_v11, 4  ;;  %v417_v19 = vrot.slane %v1736_v5, 6  ;;  %v416_v20 = vrot.slane %v1729_v2, 6  ;;  %v415_v23 = vrot.slane %v377_v11, 6  ;;  %s1488_s23 = smov 96   ;;  %s943_s25 = sshll.u32 %s1468_s7, 2 }
  0x61   : > { %vm403_vm1 = vcmp.lt.s32.totalorder %v402_v10, 4  ;;  %v419_v24 = vrot.slane %v1734_v4, 6  ;;  %vm422_vm3 = vcmp.lt.s32.totalorder %v402_v10, 2  ;;  %v440_v31 = vrot.slane %v1736_v5, 7  ;;  %s1953_s2 = sld [smem:[#allocation38_spill]]  ;;  %s730_s18 = sshll.u32 %s1714_s13, 4  ;;  %s731_s18 = int_to_ptr.vmem [resolvable:$true] %s730_s18 }
  0x62   : > { %v405_v22 = vsel %vm403_vm1, %v398_v13, %v399_v12  ;;  %v407_v25 = vsel %vm403_vm1, %v396_v15, %v397_v14  ;;  %v404_v26 = vsel %vm403_vm1, %v399_v12, %v400_v16  ;;  %v406_v27 = vsel %vm403_vm1, %v397_v14, %v398_v13 }
  0x63   : > { %p383_p0 = scmp.gt.s32.totalorder %s382_s14, 0  ;;  %525 = vmatpush.bf16.msra.mxu0 %v955_v6  ;;  %960 = vmatpush.bf16.msra.mxu2 %v955_v6  ;;  %p902_p1 = scmp.lt.s32.totalorder %s382_s14, 2  ;;  %v424_v30 = vsel %vm422_vm3, %v417_v19, %v418_v18  ;;  %v441_v32 = vrot.slane %v1727_v1, 7  ;;  %v426_v34 = vsel %vm422_vm3, %v415_v23, %v416_v20  ;;  %v423_v36 = vsel %vm422_vm3, %v418_v18, %v419_v24  ;;  %v1164_v6 = vld [vmem:[%s293_s24] ss:$0 sm:$0xff] }
  0x64   : > { %v425_v38 = vsel %vm422_vm3, %v416_v20, %v417_v19  ;;  %vm445_vm5 = vcmp.lt.s32.totalorder %v402_v10, 1  ;;  %v438_v40 = vrot.slane %v377_v11, 7  ;;  %v439_v41 = vrot.slane %v1729_v2, 7 }
  0x65   : > { %s1977_s14 = smov (!%p383_p0, %s382_s14), 0  ;;  %v442_v45 = vrot.slane %v1734_v4, 7  ;;  %v447_v51 = vsel %vm445_vm5, %v440_v31, %v441_v32  ;;  %vm513_vm9 = vcmask 523264  }
  0x66   : > { %464 = vrot.lane.b32.xlu0 %v1734_v4, %s1487_s16  ;;  %460 = vrot.lane.b32.xlu1 %v1736_v5, %s1487_s16  ;;  %s1979_s14 = smov (!%p902_p1, %s1977_s14), 2  ;;  %v449_v53 = vsel %vm445_vm5, %v438_v40, %v439_v41  ;;  %v448_v57 = vsel %vm445_vm5, %v439_v41, %v440_v31  ;;  %s716_s16 = scalar_lea.sflag [#allocation8], %s348_s11 }
  0x67   : > { %526 = vmatpush.bf16.msra.mxu0 %v954_v7  ;;  %961 = vmatpush.bf16.msra.mxu2 %v954_v7  ;;  %s908_s22 = sadd.s32 4294967295, %s1979_s14  ;;  %p387_p5 = scmp.ne.s32.totalorder %s1979_s14, 0  ;;  %v446_v55 = vsel %vm445_vm5, %v441_v32, %v442_v45 }
  0x68   : > { %p1747_p4 = scmp.ne.s32.totalorder %s908_s22, 0  ;;  %p1751_p3 = scmp.eq.s32.totalorder %s908_s22, 0 }
  0x69   : > { %p907_p6 = scmp.eq.s32.totalorder %s1979_s14, 0  ;;  %s1366_s3 = scalar_lea.hbm %s1953_s2, 384 }
  0x6a   : > { %s974_s19 = scalar_select %p1747_p4, 1, 0 }
  0x6b   : > { %527 = vmatpush.bf16.msra.mxu0 %v953_v8  ;;  %962 = vmatpush.bf16.msra.mxu2 %v953_v8  ;;  %s991_s10 = scalar_select %p1751_p3, 1, 0 }
  0x6c   : > { %v975_v17 = vstv %s974_s19  ;;  %s1040_s12 = scalar_select %p387_p5, 1, 0 }
  0x6d   : > { %v992_v21 = vstv %s991_s10  ;;  %vm976_vm2 = vcmp.ne.s32.totalorder %v975_v17, 0  ;;  %s1008_s29 = scalar_select %p907_p6, 1, 0 }
  0x6e   : > { %vm993_vm4 = vcmp.ne.s32.totalorder %v992_v21, 0  ;;  %v1041_v28 = vstv %s1040_s12  ;;  %v985_v29 = vsel %vm976_vm2, %v405_v22, 0  ;;  %v977_v33 = vsel %vm976_vm2, %v407_v25, 0  ;;  %v958_v21 = vld [vmem:[%s1703_s15 + $0x8] sm:$0xff] }
  0x6f   : > { %v989_v35 = vsel %vm976_vm2, %v404_v26, 0  ;;  %v981_v37 = vsel %vm976_vm2, %v406_v27, 0  ;;  %v1002_v39 = vsel %vm993_vm4, %v424_v30, %v985_v29  ;;  %vm1783_vm6 = vcmp.ne.s32.totalorder %v1041_v28, 0  ;;  %963 = vmatpush.bf16.msra.mxu3 %v958_v21  ;;  %673 = vmatpush.bf16.msra.mxu1 %v958_v21  ;;  %v957_v26 = vld [vmem:[%s1703_s15] sm:$0xff]  ;;  %s944_s15 = sshll.u32 %s1464_s30, 3 }
  0x70   : > { %v1009_v43 = vstv %s1008_s29  ;;  %v994_v44 = vsel %vm993_vm4, %v426_v34, %v977_v33  ;;  %v1006_v48 = vsel %vm993_vm4, %v423_v36, %v989_v35  ;;  %v998_v49 = vsel %vm993_vm4, %v425_v38, %v981_v37 }
  0x71   : > { %v1051_v50 = vsel %vm1783_vm6, %v1002_v39, 0  ;;  %vm1010_vm7 = vcmp.ne.s32.totalorder %v1009_v43, 0  ;;  %v1043_v52 = vsel %vm1783_vm6, %v994_v44, 0  ;;  %v1055_v54 = vsel %vm1783_vm6, %v1006_v48, 0 }
  0x72   : > { %v1047_v56 = vsel %vm1783_vm6, %v998_v49, 0  ;;  %v1019_v58 = vsel %vm1010_vm7, %v447_v51, %v1051_v50  ;;  %v1011_v59 = vsel %vm1010_vm7, %v449_v53, %v1043_v52  ;;  %v1023_v60 = vsel %vm1010_vm7, %v446_v55, %v1055_v54 }
  0x73   : > { %v1015_v61 = vsel %vm1010_vm7, %v448_v57, %v1047_v56  ;;  %964 = vmatpush.bf16.msra.mxu3 %v957_v26  ;;  %674 = vmatpush.bf16.msra.mxu1 %v957_v26 }
  0xd0   : > { %v1789_v46 = vpop.permute.xlu0 %462  ;;  %v1791_v47 = vpop.permute.xlu1 %458 }
  0xd1   : > { %v473_v62 = vsel %vm470_vm8, %v1019_v58, %v1789_v46  ;;  %v471_v1 = vsel %vm470_vm8, %v1011_v59, %v1791_v47 }
  0xd8   : > { %v1809_v63 = vpop.permute.xlu0 %464  ;;  %v1811_v0 = vpop.permute.xlu1 %460 }
  0xd9   : > { %v474_v2 = vsel %vm470_vm8, %v1023_v60, %v1809_v63  ;;  %v472_v3 = vsel %vm470_vm8, %v1015_v61, %v1811_v0 }
  0xda   : > { %v476_v4 = vpack.c.bf16 %v474_v2, %v473_v62  ;;  %v475_v5 = vpack.c.bf16 %v472_v3, %v471_v1 }
  0xdc   : > { %926 = vmatmul.msk.bf16.vlgmr.msra.gmra.mxu0 %vm513_vm9, %v475_v5  ;;  %927 = vmatmul.msk.bf16.vlgmr.msra.gmra.mxu2 %vm513_vm9, %v476_v4 }
 0x159   : > { %v529_v7 = vpop.f32.mrf.mxu0 }
 0x15a   : > { %v530_v8 = vadd.f32 %v1164_v6, %v529_v7 }
 0x15c   : > { %1166 = vtanh.f32 %v530_v8  ;;  %v928_v27 = vmul.f32 -1.442695, %v530_v8 }
 0x15f   : > { %v534_v9 = vpop.f32.mrf.mxu2 }
 0x160   : > { %v535_v10 = vadd.f32 %v1164_v6, %v534_v9 }
 0x161   : > { %v531_v11 = vpop.f32.mrf.mxu0 }
 0x162   : > { %v1167_v12 = vpop.eup %1166  ;;  %1168 = vtanh.f32 %v535_v10  ;;  %v532_v13 = vadd.f32 %v1164_v6, %v531_v11  ;;  %v930_v19 = vmul.f32 -1.442695, %v535_v10 }
 0x163   : > { %623 = vrot.lane.b32.xlu0 %v1167_v12, %s1488_s23 }
 0x164   : > { %1170 = vtanh.f32 %v532_v13  ;;  %v929_v28 = vmul.f32 -1.442695, %v532_v13 }
 0x167   : > { %v536_v14 = vpop.f32.mrf.mxu2 }
 0x168   : > { %v1169_v15 = vpop.eup %1168  ;;  %v537_v16 = vadd.f32 %v1164_v6, %v536_v14 }
 0x169   : > { %627 = vrot.lane.b32.xlu2 %v1169_v15, %s1488_s23 }
 0x16a   : > { %1172 = vtanh.f32 %v537_v16  ;;  %v1171_v17 = vpop.eup %1170  ;;  %v931_v20 = vmul.f32 -1.442695, %v537_v16 }
 0x16b   : > { %625 = vrot.lane.b32.xlu1 %v1171_v17, %s1488_s23  ;;  %1174 = vpow2.f32 %v930_v19 }
 0x16c   : > { %1176 = vpow2.f32 %v931_v20 }
 0x170   : > { %v1173_v18 = vpop.eup %1172 }
 0x171   : > { %629 = vrot.lane.b32.xlu2 %v1173_v18, %s1488_s23  ;;  %v1175_v22 = vpop.eup %1174 }
 0x172   : > { %v1177_v23 = vpop.eup %1176  ;;  %v553_v24 = vadd.f32 1.0, %v1175_v22 }
 0x173   : > { %v554_v25 = vadd.f32 1.0, %v1177_v23  ;;  %v1165_v23 = vld [vmem:[%s312_s17] ss:$0 sm:$0xff]  ;;  %s727_s17 = sadd.s32 %s944_s15, %s943_s25 }
 0x174   : > { %1178 = vrcp.f32 %v553_v24  ;;  %vm590_vm10 = vweird.f32 %v553_v24  ;;  %v596_v42 = vand.u32 2147483648, %v553_v24  ;;  %v594_v44 = vand.u32 2147483647, %v553_v24  ;;  %s945_s20 = sshll.u32 %s727_s17, 3 }
 0x175   : > { %1180 = vrcp.f32 %v554_v25  ;;  %v611_v48 = vand.u32 2147483648, %v554_v25  ;;  %vm605_vm14 = vweird.f32 %v554_v25  ;;  %v609_v49 = vand.u32 2147483647, %v554_v25  ;;  %s729_s6 = scalar_lea.hbm %s1953_s2, %s945_s20 }
 0x176   : > { %1182 = vpow2.f32 %v928_v27  ;;  %v597_v51 = vor.u32 1.1754944e-38, %v596_v42  ;;  %vm595_vm0 = vcmp.eq.f32.partialorder %v594_v44, 8.507059e+37  ;;  %s732_s0 = sshll.u32 %s729_s6, 4  ;;  %s733_s0 = int_to_ptr.hbm [resolvable:$true] %s732_s0 }
 0x177   : > { %1184 = vpow2.f32 %v929_v28  ;;  %v612_v55 = vor.u32 1.1754944e-38, %v611_v48  ;;  %vm610_vm1 = vcmp.eq.f32.partialorder %v609_v49, 8.507059e+37  ;;  %s1360_s14 = sshra.s32 %s733_s0, 4  ;;  %s1361_s14 = int_to_ptr.hbm [resolvable:$true] %s1360_s14 }
 0x178   : > { %s1362_s7 = scalar_lea.hbm %s1361_s14, 32  ;;  %p1367_p10 = scmp.lt.s32.totalorder %s1361_s14, %s1953_s2 }
 0x179   : > { %p1363_p7 = scmp.ne.s32.totalorder %s1361_s14, %s1362_s7  ;;  %p1368_p11 = scmp.lt.s32.totalorder %s1366_s3, %s1362_s7 }
 0x17a   : > { %v1179_v29 = vpop.eup %1178 }
 0x17b   : > { %v1181_v30 = vpop.eup %1180  ;;  %v586_v31 = vmul.f32 %v1179_v29, %v553_v24  ;;  %vm591_vm11 = vweird.f32 %v1179_v29  ;;  %p1364_p8 = pnand %p1363_p7, %p1624_p13  ;;  %p1369_p12 = por %p1368_p11, %p1367_p10 }
 0x17c   : > { %v601_v32 = vmul.f32 %v1181_v30, %v554_v25  ;;  %v1183_v33 = vpop.eup %1182  ;;  %vm606_vm12 = vweird.f32 %v1181_v30  ;;  %vm592_vm13 = vmor %vm590_vm10, %vm591_vm11 }
 0x17d   : > { %v1185_v34 = vpop.eup %1184  ;;  %v587_v35 = vsub.f32 1.0, %v586_v31  ;;  %v551_v37 = vadd.f32 1.0, %v1183_v33  ;;  %vm607_vm15 = vmor %vm605_vm14, %vm606_vm12  ;;  %p1365_p9 = pneg %p1364_p8 }
 0x17e   : > { %v602_v36 = vsub.f32 1.0, %v601_v32  ;;  %v552_v38 = vadd.f32 1.0, %v1185_v34  ;;  %v1489_v32 = vmov 0.0  }
 0x17f   : > { %v588_v39 = vmul.f32 %v1179_v29, %v587_v35  ;;  %1186 = vrcp.f32 %v551_v37  ;;  %vm560_vm4 = vweird.f32 %v551_v37  ;;  %v566_v8 = vand.u32 2147483648, %v551_v37  ;;  %p1370_p0 = pnand %p1369_p12, %p1365_p9 }
 0x180   : > { %v603_v40 = vmul.f32 %v1181_v30, %v602_v36  ;;  %1188 = vrcp.f32 %v552_v38  ;;  %v581_v9 = vand.u32 2147483648, %v552_v38  ;;  %v564_v10 = vand.u32 2147483647, %v551_v37 }
 0x181   : > { %v589_v43 = vadd.f32 %v1179_v29, %v588_v39  ;;  %vm575_vm6 = vweird.f32 %v552_v38  ;;  %v579_v11 = vand.u32 2147483647, %v552_v38  ;;  %v567_v15 = vor.u32 1.1754944e-38, %v566_v8 }
 0x182   : > { %v604_v45 = vadd.f32 %v1181_v30, %v603_v40  ;;  %v582_v16 = vor.u32 1.1754944e-38, %v581_v9  ;;  %vm565_vm9 = vcmp.eq.f32.partialorder %v564_v10, 8.507059e+37 }
 0x183   : > { %v593_v53 = vsel %vm592_vm13, %v1179_v29, %v589_v43  ;;  %vm580_vm10 = vcmp.eq.f32.partialorder %v579_v11, 8.507059e+37 }
 0x184   : > { %v608_v54 = vsel %vm607_vm15, %v1181_v30, %v604_v45  ;;  %v598_v56 = vsel %vm595_vm0, %v597_v51, %v593_v53 }
 0x185   : > { %v1187_v50 = vpop.eup %1186  ;;  %v613_v57 = vsel %vm610_vm1, %v612_v55, %v608_v54 }
 0x186   : > { %v1189_v52 = vpop.eup %1188  ;;  %v556_v59 = vmul.f32 %v1187_v50, %v551_v37  ;;  %vm561_vm2 = vweird.f32 %v1187_v50 }
 0x187   : > { %v571_v60 = vmul.f32 %v1189_v52, %v552_v38  ;;  %vm576_vm3 = vweird.f32 %v1189_v52  ;;  %vm562_vm5 = vmor %vm560_vm4, %vm561_vm2 }
 0x188   : > { %v557_v2 = vsub.f32 1.0, %v556_v59  ;;  %vm577_vm7 = vmor %vm575_vm6, %vm576_vm3 }
 0x189   : > { %v572_v3 = vsub.f32 1.0, %v571_v60 }
 0x18a   : > { %v558_v4 = vmul.f32 %v1187_v50, %v557_v2 }
 0x18b   : > { %v573_v5 = vmul.f32 %v1189_v52, %v572_v3 }
 0x18c   : > { %v559_v6 = vadd.f32 %v1187_v50, %v558_v4 }
 0x18d   : > { %v574_v7 = vadd.f32 %v1189_v52, %v573_v5 }
 0x18e   : > { %v563_v12 = vsel %vm562_vm5, %v1187_v50, %v559_v6 }
 0x18f   : > { %v578_v13 = vsel %vm577_vm7, %v1189_v52, %v574_v7  ;;  %v568_v17 = vsel %vm565_vm9, %v567_v15, %v563_v12 }
 0x190   : > { %v583_v19 = vsel %vm580_vm10, %v582_v16, %v578_v13 }
 0x1c3   : > { %v628_v41 = vpop.permute.xlu2 %627 }
 0x1c4   : > { %v637_v61 = vmul.f32 %v628_v41, %v598_v56 }
 0x1cb   : > { %v630_v58 = vpop.permute.xlu2 %629 }
 0x1cc   : > { %v638_v62 = vmul.f32 %v630_v58, %v613_v57 }
 0x1ce   : > { %v640_v1 = vpack.c.bf16 %v638_v62, %v637_v61 }
 0x1d0   : > { %941 = vmatmul.msk.bf16.vlgmr.msra.gmra.mxu3 %vm470_vm8, %v640_v1 }
 0x1d5   : > { %v624_v14 = vpop.permute.xlu0 %623 }
 0x1d6   : > { %v635_v20 = vmul.f32 %v624_v14, %v568_v17 }
 0x1dd   : > { %v626_v18 = vpop.permute.xlu1 %625 }
 0x1de   : > { %v636_v21 = vmul.f32 %v626_v18, %v583_v19 }
 0x1e0   : > { %v639_v22 = vpack.c.bf16 %v636_v21, %v635_v20 }
 0x1e2   : > { %940 = vmatmul.msk.bf16.vlgmr.msra.gmra.mxu1 %vm470_vm8, %v639_v22 }
 0x253   : > { %v681_v24 = vpop.f32.mrf.mxu3 }
 0x254   : > { %v682_v25 = vadd.f32 %v1165_v23, %v681_v24 }
 0x256   : > { %v688_v26 = vadd.f32 %v682_v25, %v1789_v46  ;;  %712 = vst.msk [vmem:[#allocation2 + $0x18] sm:$0xff] %vm470_vm8, %v682_v25 }
 0x258   : > { %698 = vrot.lane.b32.xlu1 %v688_v26, %s1488_s23 }
 0x25b   : > { %v683_v27 = vpop.f32.mrf.mxu3 }
 0x25c   : > { %v684_v28 = vadd.f32 %v1165_v23, %v683_v27 }
 0x25e   : > { %713 = vst.msk [vmem:[#allocation2 + $0x20] sm:$0xff] %vm470_vm8, %v684_v28  ;;  %v689_v34 = vadd.f32 %v684_v28, %v1809_v63 }
 0x25f   : > { %v676_v29 = vpop.f32.mrf.mxu1 }
 0x260   : > { %v677_v30 = vadd.f32 %v1165_v23, %v676_v29 }
 0x262   : > { %v686_v31 = vadd.f32 %v677_v30, %v1791_v47  ;;  %710 = vst.msk [vmem:[#allocation2 + $0x8] sm:$0xff] %vm470_vm8, %v677_v30 }
 0x263   : > { %714 = vst.msk [vmem:[#allocation2 + $0x8] sm:$0xff] %vm470_vm8, %v1489_v32 }
 0x264   : > { %694 = vrot.lane.b32.xlu2 %v686_v31, %s1488_s23 }
 0x267   : > { %v678_v46 = vpop.f32.mrf.mxu1 }
 0x268   : > { %v679_v33 = vadd.f32 %v1165_v23, %v678_v46 }
 0x26a   : > { %v687_v35 = vadd.f32 %v679_v33, %v1811_v0  ;;  %711 = vst.msk [vmem:[#allocation2 + $0x10] sm:$0xff] %vm470_vm8, %v679_v33 }
 0x26c   : > { %696 = vrot.lane.b32.xlu0 %v687_v35, %s1488_s23  ;;  %700 = vrot.lane.b32.xlu2 %v689_v34, %s1488_s23 }
 0x2be   : > { %v695_v47 = vpop.permute.xlu2 %694 }
 0x2bf   : > { %706 = vst.msk [vmem:[%s1714_s13] sm:$0xff] %vm470_vm8, %v695_v47 }
 0x2c6   : > { %v701_v36 = vpop.permute.xlu2 %700 }
 0x2c7   : > { %709 = vst.msk [vmem:[%s1714_s13 + $0x18] sm:$0xff] %vm470_vm8, %v701_v36 }
 0x2ca   : > { %v699_v37 = vpop.permute.xlu1 %698 }
 0x2cb   : > { %708 = vst.msk [vmem:[%s1714_s13 + $0x10] sm:$0xff] %vm470_vm8, %v699_v37 }
 0x2de   : > { %v697_v63 = vpop.permute.xlu0 %696 }
 0x2df   : > { %707 = vst.msk [vmem:[%s1714_s13 + $0x8] sm:$0xff] %vm470_vm8, %v697_v63 }
 0x2e0   : > { %1373 = shalt.err (!%p1370_p0)
}
 0x2e1   : > { %s1490_s11 = smov 128   ;;  %s1491_s13 = smov 8  }
 0x2e2   : > { %1024 = dma.vmem_to_hbm [thread:$0]  (%p1624_p13), %s731_s18, 512, %s733_s0, %s716_s16, %s1490_s11, %s1490_s11, %s1491_s13  }
 0x2e3 PF: > { %s1954_s10 = sld [smem:[#allocation29_spill]] }
 0x2e4   : > { %s1955_s12 = sld [smem:[#allocation25_spill]] }
 0x2e9   : > { %p1065_p1 = scmp.ge.s32.totalorder %s1954_s10, 2 }
 0x2ea   : > { %s747_s23 = sand.u32 1, %s1955_s12  }
 0x2eb   : > { %p1057_p4 = pnand %p1065_p1, %p1629_p2  ;;  %s748_s25 = scalar_lea.sflag [#allocation8], %s747_s23 }
 0x2ed   : > { %p1058_p3 = pneg %p1057_p4 }
 0x2ef   : > { %1435 = dma.done.wait (%p1058_p3), %s748_s25, 512  }
 0x2f0   : > { %1437 = vsyncadd (%p1058_p3), %s748_s25, 4294966784  ;;  %s36_s10 = sadd.s32 1, %s1954_s10   ;;  %s1957_s15 = sld [smem:[#allocation26_spill]] }
 0x2f1   : > { %p33_p5 = scmp.ge.s32.totalorder %s36_s10, 14   ;;  %s1958_s27 = sld [smem:[#allocation33_spill]] }
 0x2f2   : > { %s1959_s24 = sld [smem:[#allocation27_spill]]  ;;  %s1964_s25 = smov %s1444_s26 }
 0x2f3   : > { %s1960_s29 = sld [smem:[#allocation32_spill]]  ;;  %s1966_s0 = smov %s1456_s28 }
 0x2f4   : > { %s1961_s7 = sld [smem:[#allocation28_spill]]  ;;  %s1968_s30 = smov %s1472_s8 }
 0x2f5   : > { %s1962_s17 = sld [smem:[#allocation30_spill]] }
 0x2f6   : > { %s1963_s9 = sld [smem:[#allocation31_spill]]  ;;  %s1965_s26 = smov %s1957_s15 }
 0x2f7   :  { %35 = sbr.rel (!%p33_p5) target bundleno = 21 (0x15), region = 144 }
 0x2f8   : > { %s1967_s28 = smov %s1959_s24 }
 0x2fb   : > { %s1969_s8 = smov %s1962_s17 }
 0x2fc   :  { %754 = vsyncpa [#allocation7], 1 }
 0x2fd   :  { %756 = vsyncpa [#allocation7 + $0x1], 1 }
 0x2fe   :  { %757 = vsyncpa [#allocation10], 1 }
 0x2ff   :  { %759 = vsyncpa [#allocation10 + $0x1], 1 }
 0x300   :  { %760 = vsyncpa [#allocation13], 1 }
 0x301   :  { %762 = vsyncpa [#allocation13 + $0x1], 1 }
 0x302   :  { %763 = vsyncpa [#allocation8], 1 }
 0x303   :  { %765 = vsyncpa [#allocation8 + $0x1], 1 }
 0x304   :  { %766 = vsyncmov [#allocation3] }
 0x307   :  { %s767_s20 = vpop.sfrf %766 }
 0x308   :  { %p948_p13 = scmp.ne.s32.totalorder %s767_s20, 0 }
 0x30a   :  { %771 = shalt.err (%p948_p13)  }

</bundles_post_ra>
